<compile_context>
chip_gen: v7x
topology: tpu7x:2x2x1
jax: 0.10.0
libtpu: 0.0.40
codegen_flags: <defaults>
</compile_context>

<pallas_src>
import jax
import jax.numpy as jnp
from jax.experimental import pallas as pl
from jax.experimental.pallas import tpu as pltpu

HIDDEN = 64


def dqn_kernel(x_ref, w1_ref, b1_ref, w2_ref, b2_ref,
               w3_ref, b3_ref, w4_ref, b4_ref, o_ref):
    # x arrives in f32; cast to bf16 in-kernel (rides free VPU slack).
    h = x_ref[...].astype(jnp.bfloat16)
    # All four matmuls run on the MXU in bf16 with f32 accumulation.
    h = jnp.dot(h, w1_ref[...], preferred_element_type=jnp.float32)
    h = jnp.maximum(h + b1_ref[...], 0.0).astype(jnp.bfloat16)
    h = jnp.dot(h, w2_ref[...], preferred_element_type=jnp.float32)
    h = jnp.maximum(h + b2_ref[...], 0.0).astype(jnp.bfloat16)
    h = jnp.dot(h, w3_ref[...], preferred_element_type=jnp.float32)
    h = jnp.maximum(h + b3_ref[...], 0.0).astype(jnp.bfloat16)
    out = jnp.dot(h, w4_ref[...], preferred_element_type=jnp.float32)
    o_ref[...] = (out + b4_ref[...]).astype(o_ref.dtype)


def _round_up(x, m):
    return ((x + m - 1) // m) * m


def dqn_forward(x, params, *, tile_b=8192, min_parallel_steps=2):
    """x: (B, n_obs) f32.  params: list of (W, b) with W of shape (in, out) f32."""
    (w1, b1), (w2, b2), (w3, b3), (w4, b4) = params
    B, n_obs = x.shape
    n_actions = w4.shape[1]

    # bf16 weights (tiny, one-time); x stays f32 and is cast inside the kernel.
    w1b, w2b, w3b, w4b = (w.astype(jnp.bfloat16) for w in (w1, w2, w3, w4))

    # --- Batch tiling: few steps, near-zero padding. ---
    # Enough steps that each tile <= tile_b; for large batches force >= 2
    # steps so the "parallel" grid axis can shard across v7x's 2 TensorCores.
    n_steps = pl.cdiv(B, tile_b)
    if B >= 512 and n_steps < min_parallel_steps:
        n_steps = min_parallel_steps
    # Split evenly, round up to the 8-row sublane group: padding < 8*n_steps.
    tb = max(8, _round_up(pl.cdiv(B, n_steps), 8))
    b_pad = tb * n_steps
    if b_pad != B:
        x = jnp.pad(x, ((0, b_pad - B), (0, 0)))
    grid = (n_steps,)

    # x / out move with the grid; weights & biases are grid-invariant (resident).
    x_spec = pl.BlockSpec((tb, n_obs), lambda i: (i, 0))
    out_spec = pl.BlockSpec((tb, n_actions), lambda i: (i, 0))
    const = lambda a: pl.BlockSpec(a.shape, lambda i: (0,) * a.ndim)

    flops = 2 * b_pad * (n_obs * HIDDEN + 2 * HIDDEN * HIDDEN + HIDDEN * n_actions)
    bytes_accessed = (b_pad * n_obs * 4                                   # x f32
                      + sum(int(w.size) * 2 for w in (w1b, w2b, w3b, w4b))  # W bf16
                      + sum(int(b.size) * 4 for b in (b1, b2, b3, b4))      # b f32
                      + b_pad * n_actions * 4)                              # out f32

    out = pl.pallas_call(
        dqn_kernel,
        out_shape=jax.ShapeDtypeStruct((b_pad, n_actions), jnp.float32),
        grid=grid,
        in_specs=[x_spec,
                  const(w1b), const(b1),
                  const(w2b), const(b2),
                  const(w3b), const(b3),
                  const(w4b), const(b4)],
        out_specs=out_spec,
        compiler_params=pltpu.CompilerParams(
            dimension_semantics=("parallel",)),
        cost_estimate=pl.CostEstimate(flops=flops, transcendentals=0,
                                      bytes_accessed=bytes_accessed),
    )(x, w1b, b1, w2b, b2, w3b, b3, w4b, b4)

    return out[:B] if b_pad != B else out


def init_params(key, n_observations, n_actions):
    """Deterministic init mimicking PyTorch nn.Linear (uniform +-1/sqrt(fan_in)).
    Weights stored as (in, out)."""
    dims = [(n_observations, HIDDEN), (HIDDEN, HIDDEN),
            (HIDDEN, HIDDEN), (HIDDEN, n_actions)]
    params = []
    for (fan_in, fan_out) in dims:
        key, kw, kb = jax.random.split(key, 3)
        bound = 1.0 / jnp.sqrt(float(fan_in))
        w = jax.random.uniform(kw, (fan_in, fan_out), jnp.float32, -bound, bound)
        b = jax.random.uniform(kb, (1, fan_out), jnp.float32, -bound, bound)
        params.append((w, b))
    return params


def reference_forward(x, params):
    """Mirrors the kernel's bf16-operand / f32-accumulate arithmetic."""
    (w1, b1), (w2, b2), (w3, b3), (w4, b4) = params

    def lin(h, w, b):
        return jnp.dot(h, w.astype(jnp.bfloat16),
                       preferred_element_type=jnp.float32) + b

    h = x.astype(jnp.bfloat16)
    h = jnp.maximum(lin(h, w1, b1), 0.0).astype(jnp.bfloat16)
    h = jnp.maximum(lin(h, w2, b2), 0.0).astype(jnp.bfloat16)
    h = jnp.maximum(lin(h, w3, b3), 0.0).astype(jnp.bfloat16)
    return lin(h, w4, b4)


if __name__ == "__main__":
    # Small shapes consistent with the module (CartPole-like DQN head).
    B = 8
    n_observations = 8
    n_actions = 4

    key = jax.random.PRNGKey(0)
    key, kx = jax.random.split(key)
    x = jax.random.normal(kx, (B, n_observations), jnp.float32)
    params = init_params(key, n_observations, n_actions)

    out = jax.block_until_ready(dqn_forward(x, params))
    ref = reference_forward(x, params)
    assert out.shape == (B, n_actions), out.shape
    assert jnp.allclose(out, ref, atol=1e-2, rtol=1e-2), \
        f"max abs err {jnp.max(jnp.abs(out - ref))}"

    # Exercise the multi-step / 2-TC path (replay-buffer sized B; 1040 splits
    # into 2 tiles of 520 rows with zero padding).
    key, kx2 = jax.random.split(key)
    x_big = jax.random.normal(kx2, (1040, n_observations), jnp.float32)
    out_big = jax.block_until_ready(dqn_forward(x_big, params))
    ref_big = reference_forward(x_big, params)
    assert out_big.shape == (1040, n_actions), out_big.shape
    assert jnp.allclose(out_big, ref_big, atol=1e-2, rtol=1e-2), \
        f"max abs err {jnp.max(jnp.abs(out_big - ref_big))}"

    # Non-even split still works (small padding only in the last tile).
    key, kx3 = jax.random.split(key)
    x_odd = jax.random.normal(kx3, (1037, n_observations), jnp.float32)
    out_odd = jax.block_until_ready(dqn_forward(x_odd, params))
    ref_odd = reference_forward(x_odd, params)
    assert out_odd.shape == (1037, n_actions), out_odd.shape
    assert jnp.allclose(out_odd, ref_odd, atol=1e-2, rtol=1e-2), \
        f"max abs err {jnp.max(jnp.abs(out_odd - ref_odd))}"

    print("KERNEL_OK")
</pallas_src>

<mosaic_0001>
module attributes {stable_mosaic.version = 11 : i64} {
  func.func @dqn_kernel(%arg0: i32, %arg1: memref<8x8xf32, #tpu.memory_space<vmem>>, %arg2: memref<8x64xbf16, #tpu.memory_space<vmem>>, %arg3: memref<1x64xf32, #tpu.memory_space<vmem>>, %arg4: memref<64x64xbf16, #tpu.memory_space<vmem>>, %arg5: memref<1x64xf32, #tpu.memory_space<vmem>>, %arg6: memref<64x64xbf16, #tpu.memory_space<vmem>>, %arg7: memref<1x64xf32, #tpu.memory_space<vmem>>, %arg8: memref<64x4xbf16, #tpu.memory_space<vmem>>, %arg9: memref<1x4xf32, #tpu.memory_space<vmem>>, %arg10: memref<8x4xf32, #tpu.memory_space<vmem>>) attributes {dimension_semantics = [#tpu.dimension_semantics<parallel>], iteration_bounds = array<i64: 1>, scalar_prefetch = 0 : i64, scratch_operands = 0 : i64, tpu.core_type = #tpu.core_type<tc>, window_params = [{transform_indices = @transform_0, window_bounds = array<i64: 8, 8>}, {pipeline_mode = #tpu.pipeline_mode<synchronous>, transform_indices = @transform_1, window_bounds = array<i64: 8, 64>}, {pipeline_mode = #tpu.pipeline_mode<synchronous>, transform_indices = @transform_2, window_bounds = array<i64: 1, 64>}, {pipeline_mode = #tpu.pipeline_mode<synchronous>, transform_indices = @transform_3, window_bounds = array<i64: 64, 64>}, {pipeline_mode = #tpu.pipeline_mode<synchronous>, transform_indices = @transform_4, window_bounds = array<i64: 1, 64>}, {pipeline_mode = #tpu.pipeline_mode<synchronous>, transform_indices = @transform_5, window_bounds = array<i64: 64, 64>}, {pipeline_mode = #tpu.pipeline_mode<synchronous>, transform_indices = @transform_6, window_bounds = array<i64: 1, 64>}, {pipeline_mode = #tpu.pipeline_mode<synchronous>, transform_indices = @transform_7, window_bounds = array<i64: 64, 4>}, {pipeline_mode = #tpu.pipeline_mode<synchronous>, transform_indices = @transform_8, window_bounds = array<i64: 1, 4>}, {transform_indices = @transform_9, window_bounds = array<i64: 8, 4>}]} {
    %c0 = arith.constant 0 : index
    %c0_0 = arith.constant 0 : index
    %0 = vector.load %arg1[%c0, %c0_0] : memref<8x8xf32, #tpu.memory_space<vmem>>, vector<8x8xf32>
    %1 = arith.truncf %0 : vector<8x8xf32> to vector<8x8xbf16>
    %c0_1 = arith.constant 0 : index
    %c0_2 = arith.constant 0 : index
    %2 = vector.load %arg2[%c0_1, %c0_2] : memref<8x64xbf16, #tpu.memory_space<vmem>>, vector<8x64xbf16>
    %cst = arith.constant dense<0.000000e+00> : vector<8x64xf32>
    %3 = tpu.matmul %1, %2, %cst {dimension_numbers = #tpu.dot_dimension_numbers<[1], [0], [0], [1], [0, 0, 1, 1], [], []>} : vector<8x8xbf16>, vector<8x64xbf16>, vector<8x64xf32> -> vector<8x64xf32>
    %c0_3 = arith.constant 0 : index
    %c0_4 = arith.constant 0 : index
    %4 = vector.load %arg3[%c0_3, %c0_4] : memref<1x64xf32, #tpu.memory_space<vmem>>, vector<1x64xf32>
    %5 = vector.broadcast %4 : vector<1x64xf32> to vector<8x64xf32>
    %6 = arith.addf %3, %5 : vector<8x64xf32>
    %cst_5 = arith.constant 0.000000e+00 : f32
    %7 = vector.broadcast %cst_5 : f32 to vector<8x64xf32>
    %8 = arith.maximumf %6, %7 : vector<8x64xf32>
    %9 = arith.truncf %8 : vector<8x64xf32> to vector<8x64xbf16>
    %c0_6 = arith.constant 0 : index
    %c0_7 = arith.constant 0 : index
    %10 = vector.load %arg4[%c0_6, %c0_7] : memref<64x64xbf16, #tpu.memory_space<vmem>>, vector<64x64xbf16>
    %cst_8 = arith.constant dense<0.000000e+00> : vector<8x64xf32>
    %11 = tpu.matmul %9, %10, %cst_8 {dimension_numbers = #tpu.dot_dimension_numbers<[1], [0], [0], [1], [0, 0, 1, 1], [], []>} : vector<8x64xbf16>, vector<64x64xbf16>, vector<8x64xf32> -> vector<8x64xf32>
    %c0_9 = arith.constant 0 : index
    %c0_10 = arith.constant 0 : index
    %12 = vector.load %arg5[%c0_9, %c0_10] : memref<1x64xf32, #tpu.memory_space<vmem>>, vector<1x64xf32>
    %13 = vector.broadcast %12 : vector<1x64xf32> to vector<8x64xf32>
    %14 = arith.addf %11, %13 : vector<8x64xf32>
    %cst_11 = arith.constant 0.000000e+00 : f32
    %15 = vector.broadcast %cst_11 : f32 to vector<8x64xf32>
    %16 = arith.maximumf %14, %15 : vector<8x64xf32>
    %17 = arith.truncf %16 : vector<8x64xf32> to vector<8x64xbf16>
    %c0_12 = arith.constant 0 : index
    %c0_13 = arith.constant 0 : index
    %18 = vector.load %arg6[%c0_12, %c0_13] : memref<64x64xbf16, #tpu.memory_space<vmem>>, vector<64x64xbf16>
    %cst_14 = arith.constant dense<0.000000e+00> : vector<8x64xf32>
    %19 = tpu.matmul %17, %18, %cst_14 {dimension_numbers = #tpu.dot_dimension_numbers<[1], [0], [0], [1], [0, 0, 1, 1], [], []>} : vector<8x64xbf16>, vector<64x64xbf16>, vector<8x64xf32> -> vector<8x64xf32>
    %c0_15 = arith.constant 0 : index
    %c0_16 = arith.constant 0 : index
    %20 = vector.load %arg7[%c0_15, %c0_16] : memref<1x64xf32, #tpu.memory_space<vmem>>, vector<1x64xf32>
    %21 = vector.broadcast %20 : vector<1x64xf32> to vector<8x64xf32>
    %22 = arith.addf %19, %21 : vector<8x64xf32>
    %cst_17 = arith.constant 0.000000e+00 : f32
    %23 = vector.broadcast %cst_17 : f32 to vector<8x64xf32>
    %24 = arith.maximumf %22, %23 : vector<8x64xf32>
    %25 = arith.truncf %24 : vector<8x64xf32> to vector<8x64xbf16>
    %c0_18 = arith.constant 0 : index
    %c0_19 = arith.constant 0 : index
    %26 = vector.load %arg8[%c0_18, %c0_19] : memref<64x4xbf16, #tpu.memory_space<vmem>>, vector<64x4xbf16>
    %cst_20 = arith.constant dense<0.000000e+00> : vector<8x4xf32>
    %27 = tpu.matmul %25, %26, %cst_20 {dimension_numbers = #tpu.dot_dimension_numbers<[1], [0], [0], [1], [0, 0, 1, 1], [], []>} : vector<8x64xbf16>, vector<64x4xbf16>, vector<8x4xf32> -> vector<8x4xf32>
    %c0_21 = arith.constant 0 : index
    %c0_22 = arith.constant 0 : index
    %28 = vector.load %arg9[%c0_21, %c0_22] : memref<1x4xf32, #tpu.memory_space<vmem>>, vector<1x4xf32>
    %29 = vector.broadcast %28 : vector<1x4xf32> to vector<8x4xf32>
    %30 = arith.addf %27, %29 : vector<8x4xf32>
    %c0_23 = arith.constant 0 : index
    %c0_24 = arith.constant 0 : index
    %31 = vector.load %arg10[%c0_23, %c0_24] : memref<8x4xf32, #tpu.memory_space<vmem>>, vector<8x4xf32>
    tpu.vector_store %arg10[%c0_23, %c0_24], %30 {strides = array<i32>} : memref<8x4xf32, #tpu.memory_space<vmem>>, vector<8x4xf32>,
    return
  }
  func.func @transform_0(%arg0: i32) -> (i32, i32) {
    %c0_i32 = arith.constant 0 : i32
    %c0_i32_0 = arith.constant 0 : i32
    return %arg0, %c0_i32 : i32, i32
  }
  func.func @transform_1(%arg0: i32) -> (i32, i32) {
    %c0_i32 = arith.constant 0 : i32
    %c0_i32_0 = arith.constant 0 : i32
    %c0_i32_1 = arith.constant 0 : i32
    return %c0_i32, %c0_i32_0 : i32, i32
  }
  func.func @transform_2(%arg0: i32) -> (i32, i32) {
    %c0_i32 = arith.constant 0 : i32
    %c0_i32_0 = arith.constant 0 : i32
    %c0_i32_1 = arith.constant 0 : i32
    return %c0_i32, %c0_i32_0 : i32, i32
  }
  func.func @transform_3(%arg0: i32) -> (i32, i32) {
    %c0_i32 = arith.constant 0 : i32
    %c0_i32_0 = arith.constant 0 : i32
    %c0_i32_1 = arith.constant 0 : i32
    return %c0_i32, %c0_i32_0 : i32, i32
  }
  func.func @transform_4(%arg0: i32) -> (i32, i32) {
    %c0_i32 = arith.constant 0 : i32
    %c0_i32_0 = arith.constant 0 : i32
    %c0_i32_1 = arith.constant 0 : i32
    return %c0_i32, %c0_i32_0 : i32, i32
  }
  func.func @transform_5(%arg0: i32) -> (i32, i32) {
    %c0_i32 = arith.constant 0 : i32
    %c0_i32_0 = arith.constant 0 : i32
    %c0_i32_1 = arith.constant 0 : i32
    return %c0_i32, %c0_i32_0 : i32, i32
  }
  func.func @transform_6(%arg0: i32) -> (i32, i32) {
    %c0_i32 = arith.constant 0 : i32
    %c0_i32_0 = arith.constant 0 : i32
    %c0_i32_1 = arith.constant 0 : i32
    return %c0_i32, %c0_i32_0 : i32, i32
  }
  func.func @transform_7(%arg0: i32) -> (i32, i32) {
    %c0_i32 = arith.constant 0 : i32
    %c0_i32_0 = arith.constant 0 : i32
    %c0_i32_1 = arith.constant 0 : i32
    return %c0_i32, %c0_i32_0 : i32, i32
  }
  func.func @transform_8(%arg0: i32) -> (i32, i32) {
    %c0_i32 = arith.constant 0 : i32
    %c0_i32_0 = arith.constant 0 : i32
    %c0_i32_1 = arith.constant 0 : i32
    return %c0_i32, %c0_i32_0 : i32, i32
  }
  func.func @transform_9(%arg0: i32) -> (i32, i32) {
    %c0_i32 = arith.constant 0 : i32
    %c0_i32_0 = arith.constant 0 : i32
    return %arg0, %c0_i32 : i32, i32
  }
}

</mosaic_0001>

<bundles_post_ra>
// kernel: tpu_custom_call.1
= control target key start
LH: loop header
LB: loop body
LE: loop exit
PB: predicated region body
PF: predicated region fallthrough
CT: control target
= control target key end

     0   :  { %14 = vsyncpa [#allocation3], 0  ;;  %s485_s30 = smov [#allocation2]   ;;  %s621_s0 = inlined_call_operand.vmem [shape: f32[8,8], index: 0, kind: input, shape index: {}]   ;;  %s622_s1 = inlined_call_operand.vmem [shape: bf16[8,64], index: 1, kind: input, shape index: {}]   ;;  %s623_s2 = inlined_call_operand.vmem [shape: f32[1,64], index: 2, kind: input, shape index: {}]   ;;  %s624_s3 = inlined_call_operand.vmem [shape: bf16[64,64], index: 3, kind: input, shape index: {}]   ;;  %s625_s4 = inlined_call_operand.vmem [shape: f32[1,64], index: 4, kind: input, shape index: {}]   ;;  %s626_s5 = inlined_call_operand.hbm [shape: bf16[64,64], index: 5, kind: input, shape index: {}]   ;;  %s627_s6 = inlined_call_operand.vmem [shape: f32[1,64], index: 6, kind: input, shape index: {}]   ;;  %s628_s7 = inlined_call_operand.vmem [shape: bf16[64,4], index: 7, kind: input, shape index: {}]   ;;  %s629_s8 = inlined_call_operand.vmem [shape: f32[1,4], index: 8, kind: input, shape index: {}]   ;;  %s630_s9 = inlined_call_operand.vmem [shape: f32[8,4], index: 9, kind: output, shape index: {}]  }
   0x1   :  { %s30_s10 = sshll.u32 %s485_s30, 4  ;;  %s461_s13 = scalar_lea.hbm %s626_s5, 512  ;;  %s31_s10 = int_to_ptr.vmem [resolvable:$true] %s30_s10 }
   0x2   :  { %p462_p0 = scmp.ne.s32.totalorder %s626_s5, %s461_s13  ;;  %p465_p1 = scmp.lt.u32.totalorder %s461_s13, %s626_s5 }
   0x4   :  { %p467_p2 = pnand %p465_p1, %p462_p0 }
   0x6   :  { %470 = shalt.err (!%p467_p2)
}
   0x7   :  { %s471_s18 = scalar_lea.vmem %s31_s10, 512  ;;  %p476_p4 = scmp.lt.s32.totalorder %s31_s10, %s31_s10 }
   0x8   :  { %p472_p3 = scmp.ne.s32.totalorder %s31_s10, %s471_s18  ;;  %p477_p5 = scmp.lt.s32.totalorder %s471_s18, %s471_s18 }
   0xa   :  { %p478_p6 = por %p477_p5, %p476_p4 }
   0xc   :  { %p479_p7 = pnand %p478_p6, %p472_p3 }
   0xe   :  { %482 = shalt.err (!%p479_p7)
}
   0xf   :  { %s486_s19 = smov 64   ;;  %s487_s20 = smov 4  }
  0x10   :  { %36 = dma.hbm_to_vmem [thread:$0]  %s626_s5, 512, %s31_s10, [#allocation3], %s486_s19, %s486_s19, %s487_s20  }
  0x11   :  { %483 = dma.done.wait [#allocation3], 512  }
  0x12   :  { %484 = vsyncadd [#allocation3], 4294966784  ;;  %v488_v0 = vmov 0.0   ;;  %vm489_vm0 = vmmov 0   ;;  %vm61_vm1 = vcmask 1043456   ;;  %v47_v2 = vld [vmem:[%s621_s0] sm:$0xff] }
  0x13   :  { %402 = vmatprep.subr.bf16.mxu0 %v488_v0  ;;  %404 = vmatprep.mubr.msk.bf16.mxu0 %vm489_vm0, %v488_v0  ;;  %v49_v1 = vld [vmem:[%s622_s1] sm:$0xf]  ;;  %v48_v4 = vpack.c.bf16 %v47_v2, %v47_v2  ;;  %vm57_vm2 = vcmask 64512   ;;  %v450_v6 = vld [vmem:[%s624_s3 + $0x8] sm:$0xff]   ;;  %v451_v7 = vld [vmem:[%s624_s3 + $0x10] sm:$0xff]   ;;  %vm146_vm3 = vcmask 523264  }
  0x14   :  { %408 = vmatprep.subr.bf16.mxu1 %v488_v0  ;;  %416 = vmatprep.mubr.msk.bf16.mxu1 %vm489_vm0, %v488_v0  ;;  %v63_v3 = vsel %vm61_vm1, %v49_v1, 0  ;;  %v449_v5 = vld [vmem:[%s624_s3] sm:$0xff]   ;;  %v452_v8 = vld [vmem:[%s624_s3 + $0x18] sm:$0xff]   ;;  %v454_v10 = vld [vmem:[#allocation2 + $0x8] sm:$0xff]   ;;  %vm358_vm4 = vcmask 31744  }
  0x15   :  { %403 = vmatpush3.bf16.msra.mxu0 %v63_v3  ;;  %409 = vmatpush3.bf16.msra.mxu1 %v449_v5  ;;  %v453_v9 = vld [vmem:[#allocation2] sm:$0xff]   ;;  %v455_v19 = vld [vmem:[#allocation2 + $0x10] sm:$0xff]   ;;  %v456_v20 = vld [vmem:[#allocation2 + $0x18] sm:$0xff]  }
  0x16   :  { %420 = vmatprep.subr.bf16.mxu0 %v488_v0  ;;  %410 = vmatprep.subr.bf16.mxu1 %v488_v0  ;;  %v365_v11 = vld [vmem:[%s623_s2] ss:$0 sm:$0xff]  ;;  %v458_v22 = vld [vmem:[%s628_s7 + $0x8] sm:$0xff]   ;;  %v459_v31 = vld [vmem:[%s628_s7 + $0x10] sm:$0xff]  }
  0x17   :  { %v457_v21 = vld [vmem:[%s628_s7] sm:$0xff]   ;;  %v460_v32 = vld [vmem:[%s628_s7 + $0x18] sm:$0xff]  }
  0x18   :  { %405 = vmatmul.mubr.msk.bf16.vlgmr.msra.gmra.mrb[0].mxu0 %vm57_vm2, %v48_v4  ;;  %v367_v23 = vld [vmem:[%s625_s4] ss:$0 sm:$0xff] }
  0x19   :  { %428 = vmatprep.mubr.msk.bf16.mxu0 %vm489_vm0, %v488_v0  ;;  %411 = vmatpush3.bf16.msra.mxu1 %v450_v6  ;;  %v373_v33 = vld [vmem:[%s627_s6] ss:$0 sm:$0xff] }
  0x1a   :  { %412 = vmatprep.subr.bf16.mxu1 %v488_v0  ;;  %421 = vmatpush3.bf16.msra.mxu0 %v453_v9  ;;  %v379_v41 = vld [vmem:[%s629_s8] ss:$0 sm:$0xff] }
  0x1b   :  { %422 = vmatprep.subr.bf16.mxu0 %v488_v0 }
  0x1d   :  { %413 = vmatpush3.bf16.msra.mxu1 %v451_v7 }
  0x1e   :  { %414 = vmatprep.subr.bf16.mxu1 %v488_v0  ;;  %423 = vmatpush3.bf16.msra.mxu0 %v454_v10 }
  0x1f   :  { %424 = vmatprep.subr.bf16.mxu0 %v488_v0 }
  0x21   :  { %415 = vmatpush3.bf16.msra.mxu1 %v452_v8 }
  0x22   :  { %432 = vmatprep.subr.bf16.mxu1 %v488_v0  ;;  %425 = vmatpush3.bf16.msra.mxu0 %v455_v19 }
  0x23   :  { %426 = vmatprep.subr.bf16.mxu0 %v488_v0 }
  0x26   :  { %427 = vmatpush3.bf16.msra.mxu0 %v456_v20 }
  0xeb   :  { %v99_v12 = vpop.f32.mrb[0].mxu0 }
  0xec   :  { %v100_v13 = vadd.f32 %v365_v11, %v99_v12  ;;  %v406_v14 = vpop.f32.mrb[1].mxu0 }
  0xed   :  { %v102_v15 = vpop.f32.mrb[2].mxu0 }
  0xee   :  { %v105_v16 = vmax.f32 %v100_v13, 0.0  ;;  %v407_v17 = vpop.f32.mrb[3].mxu0 }
  0xf0   :  { %v106_v18 = vpack.c.bf16 %v105_v16, %v105_v16 }
  0xf2   :  { %417 = vmatmul.mubr.msk.bf16.vlgmr.msra.gmra.mrb[0].mxu1 %vm146_vm3, %v106_v18 }
  0xf3   :  { %440 = vmatprep.mubr.msk.bf16.mxu1 %vm489_vm0, %v488_v0  ;;  %433 = vmatpush3.bf16.msra.mxu1 %v457_v21 }
  0xf4   :  { %434 = vmatprep.subr.bf16.mxu1 %v488_v0 }
  0xf7   :  { %435 = vmatpush3.bf16.msra.mxu1 %v458_v22 }
  0xf8   :  { %436 = vmatprep.subr.bf16.mxu1 %v488_v0 }
  0xfb   :  { %437 = vmatpush3.bf16.msra.mxu1 %v459_v31 }
  0xfc   :  { %438 = vmatprep.subr.bf16.mxu1 %v488_v0 }
  0xff   :  { %439 = vmatpush3.bf16.msra.mxu1 %v460_v32 }
 0x1c5   :  { %v184_v24 = vpop.f32.mrb[0].mxu1 }
 0x1c6   :  { %v185_v25 = vadd.f32 %v367_v23, %v184_v24  ;;  %v418_v26 = vpop.f32.mrb[1].mxu1 }
 0x1c7   :  { %v187_v27 = vpop.f32.mrb[2].mxu1 }
 0x1c8   :  { %v190_v28 = vmax.f32 %v185_v25, 0.0  ;;  %v419_v29 = vpop.f32.mrb[3].mxu1 }
 0x1ca   :  { %v191_v30 = vpack.c.bf16 %v190_v28, %v190_v28 }
 0x1cc   :  { %429 = vmatmul.mubr.msk.bf16.vlgmr.msra.gmra.mrb[4].mxu0 %vm146_vm3, %v191_v30 }
 0x29f   :  { %v268_v34 = vpop.f32.mrb[4].mxu0 }
 0x2a0   :  { %v269_v35 = vadd.f32 %v373_v33, %v268_v34  ;;  %v430_v36 = vpop.f32.mrb[5].mxu0 }
 0x2a1   :  { %v271_v37 = vpop.f32.mrb[6].mxu0 }
 0x2a2   :  { %v274_v38 = vmax.f32 %v269_v35, 0.0  ;;  %v431_v39 = vpop.f32.mrb[7].mxu0 }
 0x2a4   :  { %v275_v40 = vpack.c.bf16 %v274_v38, %v274_v38 }
 0x2a6   :  { %441 = vmatmul.mubr.msk.bf16.vlgmr.msra.gmra.mrb[4].mxu1 %vm146_vm3, %v275_v40 }
 0x379   :  { %v352_v42 = vpop.f32.mrb[4].mxu1 }
 0x37a   :  { %v353_v43 = vadd.f32 %v379_v41, %v352_v42  ;;  %v442_v44 = vpop.f32.mrb[5].mxu1 }
 0x37b   :  { %v355_v45 = vpop.f32.mrb[6].mxu1 }
 0x37c   :  { %359 = vst.msk [vmem:[%s630_s9] sm:$0xff] %vm358_vm4, %v353_v43  ;;  %v443_v46 = vpop.f32.mrb[7].mxu1 }
 0x37d   :  { %364 = vsyncpa [#allocation3], 1 }

</bundles_post_ra>
